<compile_context>
chip_gen: v6e
topology: v6e:2x2x1
jax: 0.10.0
libtpu: 0.0.40
codegen_flags: <defaults>
</compile_context>

<pallas_src>
import numpy as np
import jax
import jax.numpy as jnp
from jax.experimental import pallas as pl
from jax.experimental.pallas import tpu as pltpu


# ------------------------------ fused kernel ------------------------------

def _fwd_lstm_kernel(spec_ref,
                     w1_ref, b1_ref,
                     wx2_ref, wh2_ref, b2_ref,
                     wx3_ref, wh3_ref, b3_ref,
                     wx4_ref, wh4_ref, b4_ref,
                     m12h_ref, m12c_ref, m23h_ref, m23c_ref, m34h_ref, m34c_ref,
                     o1h_ref, o1c_ref, o2h_ref, o2c_ref, o3h_ref, o3c_ref,
                     out_ref):
    H = out_ref.shape[1]
    x = spec_ref[...]                                   # (B, D) — shared by every level

    def mm(a, b_ref):
        return jnp.dot(a, b_ref[...], preferred_element_type=jnp.float32)

    def softmax_seg(conv, ones_ref):
        # Per-step (segmented) softmax over lane blocks. Max-shift dropped: conv
        # inputs are bounded nonlinearity outputs with |w| <= 1/sqrt(3), so
        # |conv| <= 2*sqrt(3); exp cannot overflow and softmax is shift-invariant.
        e = jnp.exp(conv)
        s = mm(e, ones_ref)      # block-of-ones matmul: per-segment sum, broadcast
        return e / s             # exact divide (negligible cost, tighter numerics)

    def gates_split(g):
        # One full-tile sigmoid pass (EUP) over all 4H lanes, tanh only on the g slab.
        sg = jax.nn.sigmoid(g)
        return (sg[:, 0:H], sg[:, H:2 * H],
                jnp.tanh(g[:, 2 * H:3 * H]), sg[:, 3 * H:4 * H])

    # ---- level 1: single step, zero initial state (no W_hh term, f-gate unused) ----
    g1 = mm(x, w1_ref) + b1_ref[...]                    # (B, 4H)
    i1, _, gg1, o1 = gates_split(g1)
    c1 = i1 * gg1                                       # f*c == 0 with zero state
    h1 = o1 * jnp.tanh(c1)
    hb1 = softmax_seg(mm(h1, m12h_ref), o1h_ref)        # (B, H/2) level-1 h backup
    cb1 = softmax_seg(mm(c1, m12c_ref), o1c_ref)        # (B, H)  c backup, pre-replicated

    # ---- level 2: 2 steps lane-packed; seed replication folded into Wh2 / M12c ----
    g2 = mm(x, wx2_ref) + mm(hb1, wh2_ref) + b2_ref[...]
    i2, f2, gg2, o2 = gates_split(g2)
    c2 = f2 * cb1 + i2 * gg2                            # (B, H), step-major lanes
    h2 = o2 * jnp.tanh(c2)
    hb2 = softmax_seg(mm(h2, m23h_ref), o2h_ref)        # (B, H/2)
    cb2 = softmax_seg(mm(c2, m23c_ref), o2c_ref)        # (B, H)

    # ---- level 3: 4 steps lane-packed (reference quirk: trans3_4h for h AND c) ----
    g3 = mm(x, wx3_ref) + mm(hb2, wh3_ref) + b3_ref[...]
    i3, f3, gg3, o3 = gates_split(g3)
    c3 = f3 * cb2 + i3 * gg3
    h3 = o3 * jnp.tanh(c3)
    hb3 = softmax_seg(mm(h3, m34h_ref), o3h_ref)        # (B, H/2)
    cb3 = softmax_seg(mm(c3, m34c_ref), o3c_ref)        # (B, H)

    # ---- level 4: 8 steps; only the cell state is needed and it IS out4 ----
    g4 = mm(x, wx4_ref) + mm(hb3, wh4_ref) + b4_ref[...]
    i4, f4, gg4, _ = gates_split(g4)
    out_ref[...] = (f4 * cb3 + i4 * gg4).astype(out_ref.dtype)


# ------------------------------ host-side packing ------------------------------

def _conv_matrix(w, L):
    """Banded (L, L//2) M s.t. (h @ M)[:, j] = w0*h[2j-1] + w1*h[2j] + w2*h[2j+1] (zero pad)."""
    assert L % 2 == 0, "trans conv matrix assumes even input length"
    w = np.asarray(w, np.float32)
    M = np.zeros((L, L // 2), np.float32)
    for j in range(L // 2):
        if 2 * j - 1 >= 0:
            M[2 * j - 1, j] += w[0]
        M[2 * j, j] += w[1]
        if 2 * j + 1 < L:
            M[2 * j + 1, j] += w[2]
    return M


def _trans_block(w, n_src, hl, replicate):
    """Block conv matrix applying `trans` independently to each of n_src lane segments.

    Source layout: (B, n_src*hl), step-major. Each segment convolves to hl//2 lanes.
    With replicate=True each segment's output is written to TWO adjacent destination
    blocks (folds the next level's backup[i//2] seed replication into the matrix).
    """
    M = _conv_matrix(w, hl)
    ho = hl // 2
    rep = 2 if replicate else 1
    out = np.zeros((n_src * hl, n_src * ho * rep), np.float32)
    for j in range(n_src):
        for r in range(rep):
            out[j * hl:(j + 1) * hl, (j * rep + r) * ho:(j * rep + r + 1) * ho] = M
    return out


def _seg_ones(total, seg):
    """(total, total) block-diag of ones blocks: e @ O = per-segment sum broadcast per lane."""
    out = np.zeros((total, total), np.float32)
    for j in range(total // seg):
        out[j * seg:(j + 1) * seg, j * seg:(j + 1) * seg] = 1.0
    return out


def _pack_level_weights(wih, whh, bih, bhh, n_steps, D, H):
    """Lane-packed, gate-major block weights for a level with n_steps independent steps.

    Column layout of the (.., 4H) gate tile: cols [g*H + i*HL : g*H + (i+1)*HL] hold
    gate g (i,f,g,o order) of step i.  W_ih is block-diagonal over steps (so `spec`
    is consumed directly); W_hh rows index the previous level's packed backups and
    carry the backup[i//2] replication in their block structure.
    """
    hl, il = H // n_steps, D // n_steps
    wihT = np.asarray(wih, np.float32).T      # (il, 4*hl)
    whhT = np.asarray(whh, np.float32).T      # (hl, 4*hl)
    b = np.asarray(bih, np.float32) + np.asarray(bhh, np.float32)
    Wx = np.zeros((D, 4 * H), np.float32)
    Wh = np.zeros((H // 2, 4 * H), np.float32)
    bp = np.zeros((1, 4 * H), np.float32)
    for i in range(n_steps):
        src = (i // 2) * hl
        for g in range(4):
            cols = slice(g * H + i * hl, g * H + (i + 1) * hl)
            Wx[i * il:(i + 1) * il, cols] = wihT[:, g * hl:(g + 1) * hl]
            Wh[src:src + hl, cols] = whhT[:, g * hl:(g + 1) * hl]
            bp[0, cols] = b[g * hl:(g + 1) * hl]
    return Wx, Wh, bp


def init_params(key, input_dim, output_dim):
    """PyTorch-style parameters (LSTMCell / Conv1d default inits)."""
    params = {}
    dims = [(input_dim, output_dim), (input_dim // 2, output_dim // 2),
            (input_dim // 4, output_dim // 4), (input_dim // 8, output_dim // 8)]
    for idx, (I, Hp) in enumerate(dims, start=1):
        key, k1, k2, k3, k4 = jax.random.split(key, 5)
        bound = 1.0 / np.sqrt(Hp)
        params[f"cell_{idx}"] = (
            jax.random.uniform(k1, (4 * Hp, I), jnp.float32, -bound, bound),   # W_ih
            jax.random.uniform(k2, (4 * Hp, Hp), jnp.float32, -bound, bound),  # W_hh
            jax.random.uniform(k3, (4 * Hp,), jnp.float32, -bound, bound),     # b_ih
            jax.random.uniform(k4, (4 * Hp,), jnp.float32, -bound, bound))     # b_hh
    for name in ["trans1_2h", "trans1_2c", "trans2_3h", "trans2_3c",
                 "trans3_4h", "trans3_4c"]:
        key, k = jax.random.split(key)
        bound = 1.0 / np.sqrt(3.0)
        params[name] = jax.random.uniform(k, (3,), jnp.float32, -bound, bound)
    # TODO(synk): self.fc (Linear(output_dim*4, output_dim)) and out1/out2/out3 never
    # contribute to the returned out4 in the reference forward; omitted.
    return params


def prepare_kernel_args(params, input_dim, output_dim):
    D, H = input_dim, output_dim
    assert D % 8 == 0 and H % 8 == 0, "pyramid assumes dims divisible by 8"
    wih1, whh1, bih1, bhh1 = params["cell_1"]
    prep = {
        "W1": np.asarray(wih1, np.float32).T,                                   # (D, 4H)
        "b1": (np.asarray(bih1, np.float32) + np.asarray(bhh1, np.float32))[None, :],
    }
    for lvl, n in ((2, 2), (3, 4), (4, 8)):
        Wx, Wh, bp = _pack_level_weights(*params[f"cell_{lvl}"], n, D, H)
        prep[f"Wx{lvl}"], prep[f"Wh{lvl}"], prep[f"b{lvl}"] = Wx, Wh, bp
    # trans conv matrices (h path plain block-diag; c path with seed replication folded in)
    prep["M12h"] = _trans_block(params["trans1_2h"], 1, H, replicate=False)      # (H, H/2)
    prep["M12c"] = _trans_block(params["trans1_2c"], 1, H, replicate=True)       # (H, H)
    prep["M23h"] = _trans_block(params["trans2_3h"], 2, H // 2, replicate=False)
    prep["M23c"] = _trans_block(params["trans2_3c"], 2, H // 2, replicate=True)
    # reference quirk: trans3_4h is applied to BOTH hx3 and cx3 (trans3_4c unused)
    prep["M34h"] = _trans_block(params["trans3_4h"], 4, H // 4, replicate=False)
    prep["M34c"] = _trans_block(params["trans3_4h"], 4, H // 4, replicate=True)
    # segmented-softmax denominator matrices (per-step lane-block sums)
    prep["O1h"] = _seg_ones(H // 2, H // 2)
    prep["O1c"] = _seg_ones(H, H // 2)
    prep["O2h"] = _seg_ones(H // 2, H // 4)
    prep["O2c"] = _seg_ones(H, H // 4)
    prep["O3h"] = _seg_ones(H // 2, H // 8)
    prep["O3c"] = _seg_ones(H, H // 8)
    return {k: jnp.asarray(v, jnp.float32) for k, v in prep.items()}


def fwd_lstm_pallas(spec, prep):
    B = spec.shape[0]
    H = prep["W1"].shape[1] // 4
    args = (spec,
            prep["W1"], prep["b1"],
            prep["Wx2"], prep["Wh2"], prep["b2"],
            prep["Wx3"], prep["Wh3"], prep["b3"],
            prep["Wx4"], prep["Wh4"], prep["b4"],
            prep["M12h"], prep["M12c"], prep["M23h"], prep["M23c"],
            prep["M34h"], prep["M34c"],
            prep["O1h"], prep["O1c"], prep["O2h"], prep["O2c"],
            prep["O3h"], prep["O3c"])
    vmem = pl.BlockSpec(memory_space=pltpu.MemorySpace.VMEM)
    # Grid-less single invocation: ~50 KiB resident, latency-bound. Add a batch grid
    # (dimension_semantics=("parallel",)) only if B grows into the hundreds.
    return pl.pallas_call(
        _fwd_lstm_kernel,
        out_shape=jax.ShapeDtypeStruct((B, H), jnp.float32),
        in_specs=[vmem] * len(args),
        out_specs=vmem,
    )(*args)


fwd_lstm_pallas_jit = jax.jit(fwd_lstm_pallas)


# ------------------------ pure-JAX reference (validation) ------------------------

def fwd_lstm_reference(spec, params, input_dim, output_dim):
    D, H = input_dim, output_dim
    B = spec.shape[0]

    def cell(x, h, c, wih, whh, bih, bhh):
        hp = h.shape[1]
        gates = x @ wih.T + bih + h @ whh.T + bhh
        i_g = jax.nn.sigmoid(gates[:, :hp])
        f_g = jax.nn.sigmoid(gates[:, hp:2 * hp])
        g_g = jnp.tanh(gates[:, 2 * hp:3 * hp])
        o_g = jax.nn.sigmoid(gates[:, 3 * hp:])
        c_new = f_g * c + i_g * g_g
        return o_g * jnp.tanh(c_new), c_new

    def tr(h, w):
        L = h.shape[1]
        hp = jnp.pad(h, ((0, 0), (1, 1)))
        conv = w[0] * hp[:, 0:L:2] + w[1] * hp[:, 1:L + 1:2] + w[2] * hp[:, 2:L + 2:2]
        return jax.nn.softmax(conv, axis=-1)

    z = jnp.zeros((B, H), jnp.float32)
    h1, c1 = cell(spec, z, z, *params["cell_1"])
    hb = [tr(h1, params["trans1_2h"])]
    cb = [tr(c1, params["trans1_2c"])]

    hb2, cb2 = [], []
    for i in range(2):
        xi = spec[:, i * (D // 2):(i + 1) * (D // 2)]
        h2, c2 = cell(xi, hb[i // 2], cb[i // 2], *params["cell_2"])
        hb2.append(tr(h2, params["trans2_3h"]))
        cb2.append(tr(c2, params["trans2_3c"]))

    hb3, cb3 = [], []
    for i in range(4):
        xi = spec[:, i * (D // 4):(i + 1) * (D // 4)]
        h3, c3 = cell(xi, hb2[i // 2], cb2[i // 2], *params["cell_3"])
        hb3.append(tr(h3, params["trans3_4h"]))
        cb3.append(tr(c3, params["trans3_4h"]))   # reference quirk reproduced

    outs = []
    for i in range(8):
        xi = spec[:, i * (D // 8):(i + 1) * (D // 8)]
        _, c4 = cell(xi, hb3[i // 2], cb3[i // 2], *params["cell_4"])
        outs.append(c4)
    return jnp.concatenate(outs, axis=-1)


# --------------------------------- main ---------------------------------

if __name__ == "__main__":
    input_dim, output_dim, B = 32, 32, 4

    key = jax.random.PRNGKey(0)
    kp, kx = jax.random.split(key)
    params = init_params(kp, input_dim, output_dim)
    spec = jax.random.normal(kx, (B, input_dim), jnp.float32)

    prep = prepare_kernel_args(params, input_dim, output_dim)
    out = jax.block_until_ready(fwd_lstm_pallas_jit(spec, prep))

    ref = jax.block_until_ready(fwd_lstm_reference(spec, params, input_dim, output_dim))

    assert out.shape == (B, output_dim), out.shape
    np.testing.assert_allclose(np.asarray(out), np.asarray(ref), atol=1e-2, rtol=1e-2)
    print("KERNEL_OK")
</pallas_src>

<mosaic_0001>
module attributes {stable_mosaic.version = 11 : i64} {
  func.func @_fwd_lstm_kernel(%arg0: memref<4x32xf32, #tpu.memory_space<vmem>>, %arg1: memref<32x128xf32, #tpu.memory_space<vmem>>, %arg2: memref<1x128xf32, #tpu.memory_space<vmem>>, %arg3: memref<32x128xf32, #tpu.memory_space<vmem>>, %arg4: memref<16x128xf32, #tpu.memory_space<vmem>>, %arg5: memref<1x128xf32, #tpu.memory_space<vmem>>, %arg6: memref<32x128xf32, #tpu.memory_space<vmem>>, %arg7: memref<16x128xf32, #tpu.memory_space<vmem>>, %arg8: memref<1x128xf32, #tpu.memory_space<vmem>>, %arg9: memref<32x128xf32, #tpu.memory_space<vmem>>, %arg10: memref<16x128xf32, #tpu.memory_space<vmem>>, %arg11: memref<1x128xf32, #tpu.memory_space<vmem>>, %arg12: memref<32x16xf32, #tpu.memory_space<vmem>>, %arg13: memref<32x32xf32, #tpu.memory_space<vmem>>, %arg14: memref<32x16xf32, #tpu.memory_space<vmem>>, %arg15: memref<32x32xf32, #tpu.memory_space<vmem>>, %arg16: memref<32x16xf32, #tpu.memory_space<vmem>>, %arg17: memref<32x32xf32, #tpu.memory_space<vmem>>, %arg18: memref<16x16xf32, #tpu.memory_space<vmem>>, %arg19: memref<32x32xf32, #tpu.memory_space<vmem>>, %arg20: memref<16x16xf32, #tpu.memory_space<vmem>>, %arg21: memref<32x32xf32, #tpu.memory_space<vmem>>, %arg22: memref<16x16xf32, #tpu.memory_space<vmem>>, %arg23: memref<32x32xf32, #tpu.memory_space<vmem>>, %arg24: memref<4x32xf32, #tpu.memory_space<vmem>>) attributes {dimension_semantics = [], scalar_prefetch = 0 : i64, scratch_operands = 0 : i64, tpu.core_type = #tpu.core_type<tc>} {
    %c0 = arith.constant 0 : index
    %c0_0 = arith.constant 0 : index
    %0 = vector.load %arg0[%c0, %c0_0] : memref<4x32xf32, #tpu.memory_space<vmem>>, vector<4x32xf32>
    %c0_1 = arith.constant 0 : index
    %c0_2 = arith.constant 0 : index
    %1 = vector.load %arg1[%c0_1, %c0_2] : memref<32x128xf32, #tpu.memory_space<vmem>>, vector<32x128xf32>
    %cst = arith.constant dense<0.000000e+00> : vector<4x128xf32>
    %2 = tpu.matmul %0, %1, %cst {dimension_numbers = #tpu.dot_dimension_numbers<[1], [0], [0], [1], [0, 0, 1, 1], [], []>} : vector<4x32xf32>, vector<32x128xf32>, vector<4x128xf32> -> vector<4x128xf32>
    %c0_3 = arith.constant 0 : index
    %c0_4 = arith.constant 0 : index
    %3 = vector.load %arg2[%c0_3, %c0_4] : memref<1x128xf32, #tpu.memory_space<vmem>>, vector<1x128xf32>
    %4 = vector.broadcast %3 : vector<1x128xf32> to vector<4x128xf32>
    %5 = arith.addf %2, %4 : vector<4x128xf32>
    %6 = arith.negf %5 : vector<4x128xf32>
    %7 = math.exp %6 : vector<4x128xf32>
    %cst_5 = arith.constant 1.000000e+00 : f32
    %8 = vector.broadcast %cst_5 : f32 to vector<4x128xf32>
    %9 = arith.addf %8, %7 : vector<4x128xf32>
    %10 = arith.divf %8, %9 : vector<4x128xf32>
    %11 = vector.extract_strided_slice %10 {offsets = [0, 0], sizes = [4, 32], strides = [1, 1]} : vector<4x128xf32> to vector<4x32xf32>
    %12 = vector.extract_strided_slice %5 {offsets = [0, 64], sizes = [4, 32], strides = [1, 1]} : vector<4x128xf32> to vector<4x32xf32>
    %13 = math.tanh %12 : vector<4x32xf32>
    %14 = vector.extract_strided_slice %10 {offsets = [0, 96], sizes = [4, 32], strides = [1, 1]} : vector<4x128xf32> to vector<4x32xf32>
    %15 = arith.mulf %11, %13 : vector<4x32xf32>
    %16 = math.tanh %15 : vector<4x32xf32>
    %17 = arith.mulf %14, %16 : vector<4x32xf32>
    %c0_6 = arith.constant 0 : index
    %c0_7 = arith.constant 0 : index
    %18 = vector.load %arg12[%c0_6, %c0_7] : memref<32x16xf32, #tpu.memory_space<vmem>>, vector<32x16xf32>
    %cst_8 = arith.constant dense<0.000000e+00> : vector<4x16xf32>
    %19 = tpu.matmul %17, %18, %cst_8 {dimension_numbers = #tpu.dot_dimension_numbers<[1], [0], [0], [1], [0, 0, 1, 1], [], []>} : vector<4x32xf32>, vector<32x16xf32>, vector<4x16xf32> -> vector<4x16xf32>
    %20 = math.exp %19 : vector<4x16xf32>
    %c0_9 = arith.constant 0 : index
    %c0_10 = arith.constant 0 : index
    %21 = vector.load %arg18[%c0_9, %c0_10] : memref<16x16xf32, #tpu.memory_space<vmem>>, vector<16x16xf32>
    %cst_11 = arith.constant dense<0.000000e+00> : vector<4x16xf32>
    %22 = tpu.matmul %20, %21, %cst_11 {dimension_numbers = #tpu.dot_dimension_numbers<[1], [0], [0], [1], [0, 0, 1, 1], [], []>} : vector<4x16xf32>, vector<16x16xf32>, vector<4x16xf32> -> vector<4x16xf32>
    %23 = arith.divf %20, %22 : vector<4x16xf32>
    %c0_12 = arith.constant 0 : index
    %c0_13 = arith.constant 0 : index
    %24 = vector.load %arg13[%c0_12, %c0_13] : memref<32x32xf32, #tpu.memory_space<vmem>>, vector<32x32xf32>
    %cst_14 = arith.constant dense<0.000000e+00> : vector<4x32xf32>
    %25 = tpu.matmul %15, %24, %cst_14 {dimension_numbers = #tpu.dot_dimension_numbers<[1], [0], [0], [1], [0, 0, 1, 1], [], []>} : vector<4x32xf32>, vector<32x32xf32>, vector<4x32xf32> -> vector<4x32xf32>
    %26 = math.exp %25 : vector<4x32xf32>
    %c0_15 = arith.constant 0 : index
    %c0_16 = arith.constant 0 : index
    %27 = vector.load %arg19[%c0_15, %c0_16] : memref<32x32xf32, #tpu.memory_space<vmem>>, vector<32x32xf32>
    %cst_17 = arith.constant dense<0.000000e+00> : vector<4x32xf32>
    %28 = tpu.matmul %26, %27, %cst_17 {dimension_numbers = #tpu.dot_dimension_numbers<[1], [0], [0], [1], [0, 0, 1, 1], [], []>} : vector<4x32xf32>, vector<32x32xf32>, vector<4x32xf32> -> vector<4x32xf32>
    %29 = arith.divf %26, %28 : vector<4x32xf32>
    %c0_18 = arith.constant 0 : index
    %c0_19 = arith.constant 0 : index
    %30 = vector.load %arg3[%c0_18, %c0_19] : memref<32x128xf32, #tpu.memory_space<vmem>>, vector<32x128xf32>
    %cst_20 = arith.constant dense<0.000000e+00> : vector<4x128xf32>
    %31 = tpu.matmul %0, %30, %cst_20 {dimension_numbers = #tpu.dot_dimension_numbers<[1], [0], [0], [1], [0, 0, 1, 1], [], []>} : vector<4x32xf32>, vector<32x128xf32>, vector<4x128xf32> -> vector<4x128xf32>
    %c0_21 = arith.constant 0 : index
    %c0_22 = arith.constant 0 : index
    %32 = vector.load %arg4[%c0_21, %c0_22] : memref<16x128xf32, #tpu.memory_space<vmem>>, vector<16x128xf32>
    %cst_23 = arith.constant dense<0.000000e+00> : vector<4x128xf32>
    %33 = tpu.matmul %23, %32, %cst_23 {dimension_numbers = #tpu.dot_dimension_numbers<[1], [0], [0], [1], [0, 0, 1, 1], [], []>} : vector<4x16xf32>, vector<16x128xf32>, vector<4x128xf32> -> vector<4x128xf32>
    %34 = arith.addf %31, %33 : vector<4x128xf32>
    %c0_24 = arith.constant 0 : index
    %c0_25 = arith.constant 0 : index
    %35 = vector.load %arg5[%c0_24, %c0_25] : memref<1x128xf32, #tpu.memory_space<vmem>>, vector<1x128xf32>
    %36 = vector.broadcast %35 : vector<1x128xf32> to vector<4x128xf32>
    %37 = arith.addf %34, %36 : vector<4x128xf32>
    %38 = arith.negf %37 : vector<4x128xf32>
    %39 = math.exp %38 : vector<4x128xf32>
    %cst_26 = arith.constant 1.000000e+00 : f32
    %40 = vector.broadcast %cst_26 : f32 to vector<4x128xf32>
    %41 = arith.addf %40, %39 : vector<4x128xf32>
    %42 = arith.divf %40, %41 : vector<4x128xf32>
    %43 = vector.extract_strided_slice %42 {offsets = [0, 0], sizes = [4, 32], strides = [1, 1]} : vector<4x128xf32> to vector<4x32xf32>
    %44 = vector.extract_strided_slice %42 {offsets = [0, 32], sizes = [4, 32], strides = [1, 1]} : vector<4x128xf32> to vector<4x32xf32>
    %45 = vector.extract_strided_slice %37 {offsets = [0, 64], sizes = [4, 32], strides = [1, 1]} : vector<4x128xf32> to vector<4x32xf32>
    %46 = math.tanh %45 : vector<4x32xf32>
    %47 = vector.extract_strided_slice %42 {offsets = [0, 96], sizes = [4, 32], strides = [1, 1]} : vector<4x128xf32> to vector<4x32xf32>
    %48 = arith.mulf %44, %29 : vector<4x32xf32>
    %49 = arith.mulf %43, %46 : vector<4x32xf32>
    %50 = arith.addf %48, %49 : vector<4x32xf32>
    %51 = math.tanh %50 : vector<4x32xf32>
    %52 = arith.mulf %47, %51 : vector<4x32xf32>
    %c0_27 = arith.constant 0 : index
    %c0_28 = arith.constant 0 : index
    %53 = vector.load %arg14[%c0_27, %c0_28] : memref<32x16xf32, #tpu.memory_space<vmem>>, vector<32x16xf32>
    %cst_29 = arith.constant dense<0.000000e+00> : vector<4x16xf32>
    %54 = tpu.matmul %52, %53, %cst_29 {dimension_numbers = #tpu.dot_dimension_numbers<[1], [0], [0], [1], [0, 0, 1, 1], [], []>} : vector<4x32xf32>, vector<32x16xf32>, vector<4x16xf32> -> vector<4x16xf32>
    %55 = math.exp %54 : vector<4x16xf32>
    %c0_30 = arith.constant 0 : index
    %c0_31 = arith.constant 0 : index
    %56 = vector.load %arg20[%c0_30, %c0_31] : memref<16x16xf32, #tpu.memory_space<vmem>>, vector<16x16xf32>
    %cst_32 = arith.constant dense<0.000000e+00> : vector<4x16xf32>
    %57 = tpu.matmul %55, %56, %cst_32 {dimension_numbers = #tpu.dot_dimension_numbers<[1], [0], [0], [1], [0, 0, 1, 1], [], []>} : vector<4x16xf32>, vector<16x16xf32>, vector<4x16xf32> -> vector<4x16xf32>
    %58 = arith.divf %55, %57 : vector<4x16xf32>
    %c0_33 = arith.constant 0 : index
    %c0_34 = arith.constant 0 : index
    %59 = vector.load %arg15[%c0_33, %c0_34] : memref<32x32xf32, #tpu.memory_space<vmem>>, vector<32x32xf32>
    %cst_35 = arith.constant dense<0.000000e+00> : vector<4x32xf32>
    %60 = tpu.matmul %50, %59, %cst_35 {dimension_numbers = #tpu.dot_dimension_numbers<[1], [0], [0], [1], [0, 0, 1, 1], [], []>} : vector<4x32xf32>, vector<32x32xf32>, vector<4x32xf32> -> vector<4x32xf32>
    %61 = math.exp %60 : vector<4x32xf32>
    %c0_36 = arith.constant 0 : index
    %c0_37 = arith.constant 0 : index
    %62 = vector.load %arg21[%c0_36, %c0_37] : memref<32x32xf32, #tpu.memory_space<vmem>>, vector<32x32xf32>
    %cst_38 = arith.constant dense<0.000000e+00> : vector<4x32xf32>
    %63 = tpu.matmul %61, %62, %cst_38 {dimension_numbers = #tpu.dot_dimension_numbers<[1], [0], [0], [1], [0, 0, 1, 1], [], []>} : vector<4x32xf32>, vector<32x32xf32>, vector<4x32xf32> -> vector<4x32xf32>
    %64 = arith.divf %61, %63 : vector<4x32xf32>
    %c0_39 = arith.constant 0 : index
    %c0_40 = arith.constant 0 : index
    %65 = vector.load %arg6[%c0_39, %c0_40] : memref<32x128xf32, #tpu.memory_space<vmem>>, vector<32x128xf32>
    %cst_41 = arith.constant dense<0.000000e+00> : vector<4x128xf32>
    %66 = tpu.matmul %0, %65, %cst_41 {dimension_numbers = #tpu.dot_dimension_numbers<[1], [0], [0], [1], [0, 0, 1, 1], [], []>} : vector<4x32xf32>, vector<32x128xf32>, vector<4x128xf32> -> vector<4x128xf32>
    %c0_42 = arith.constant 0 : index
    %c0_43 = arith.constant 0 : index
    %67 = vector.load %arg7[%c0_42, %c0_43] : memref<16x128xf32, #tpu.memory_space<vmem>>, vector<16x128xf32>
    %cst_44 = arith.constant dense<0.000000e+00> : vector<4x128xf32>
    %68 = tpu.matmul %58, %67, %cst_44 {dimension_numbers = #tpu.dot_dimension_numbers<[1], [0], [0], [1], [0, 0, 1, 1], [], []>} : vector<4x16xf32>, vector<16x128xf32>, vector<4x128xf32> -> vector<4x128xf32>
    %69 = arith.addf %66, %68 : vector<4x128xf32>
    %c0_45 = arith.constant 0 : index
    %c0_46 = arith.constant 0 : index
    %70 = vector.load %arg8[%c0_45, %c0_46] : memref<1x128xf32, #tpu.memory_space<vmem>>, vector<1x128xf32>
    %71 = vector.broadcast %70 : vector<1x128xf32> to vector<4x128xf32>
    %72 = arith.addf %69, %71 : vector<4x128xf32>
    %73 = arith.negf %72 : vector<4x128xf32>
    %74 = math.exp %73 : vector<4x128xf32>
    %cst_47 = arith.constant 1.000000e+00 : f32
    %75 = vector.broadcast %cst_47 : f32 to vector<4x128xf32>
    %76 = arith.addf %75, %74 : vector<4x128xf32>
    %77 = arith.divf %75, %76 : vector<4x128xf32>
    %78 = vector.extract_strided_slice %77 {offsets = [0, 0], sizes = [4, 32], strides = [1, 1]} : vector<4x128xf32> to vector<4x32xf32>
    %79 = vector.extract_strided_slice %77 {offsets = [0, 32], sizes = [4, 32], strides = [1, 1]} : vector<4x128xf32> to vector<4x32xf32>
    %80 = vector.extract_strided_slice %72 {offsets = [0, 64], sizes = [4, 32], strides = [1, 1]} : vector<4x128xf32> to vector<4x32xf32>
    %81 = math.tanh %80 : vector<4x32xf32>
    %82 = vector.extract_strided_slice %77 {offsets = [0, 96], sizes = [4, 32], strides = [1, 1]} : vector<4x128xf32> to vector<4x32xf32>
    %83 = arith.mulf %79, %64 : vector<4x32xf32>
    %84 = arith.mulf %78, %81 : vector<4x32xf32>
    %85 = arith.addf %83, %84 : vector<4x32xf32>
    %86 = math.tanh %85 : vector<4x32xf32>
    %87 = arith.mulf %82, %86 : vector<4x32xf32>
    %c0_48 = arith.constant 0 : index
    %c0_49 = arith.constant 0 : index
    %88 = vector.load %arg16[%c0_48, %c0_49] : memref<32x16xf32, #tpu.memory_space<vmem>>, vector<32x16xf32>
    %cst_50 = arith.constant dense<0.000000e+00> : vector<4x16xf32>
    %89 = tpu.matmul %87, %88, %cst_50 {dimension_numbers = #tpu.dot_dimension_numbers<[1], [0], [0], [1], [0, 0, 1, 1], [], []>} : vector<4x32xf32>, vector<32x16xf32>, vector<4x16xf32> -> vector<4x16xf32>
    %90 = math.exp %89 : vector<4x16xf32>
    %c0_51 = arith.constant 0 : index
    %c0_52 = arith.constant 0 : index
    %91 = vector.load %arg22[%c0_51, %c0_52] : memref<16x16xf32, #tpu.memory_space<vmem>>, vector<16x16xf32>
    %cst_53 = arith.constant dense<0.000000e+00> : vector<4x16xf32>
    %92 = tpu.matmul %90, %91, %cst_53 {dimension_numbers = #tpu.dot_dimension_numbers<[1], [0], [0], [1], [0, 0, 1, 1], [], []>} : vector<4x16xf32>, vector<16x16xf32>, vector<4x16xf32> -> vector<4x16xf32>
    %93 = arith.divf %90, %92 : vector<4x16xf32>
    %c0_54 = arith.constant 0 : index
    %c0_55 = arith.constant 0 : index
    %94 = vector.load %arg17[%c0_54, %c0_55] : memref<32x32xf32, #tpu.memory_space<vmem>>, vector<32x32xf32>
    %cst_56 = arith.constant dense<0.000000e+00> : vector<4x32xf32>
    %95 = tpu.matmul %85, %94, %cst_56 {dimension_numbers = #tpu.dot_dimension_numbers<[1], [0], [0], [1], [0, 0, 1, 1], [], []>} : vector<4x32xf32>, vector<32x32xf32>, vector<4x32xf32> -> vector<4x32xf32>
    %96 = math.exp %95 : vector<4x32xf32>
    %c0_57 = arith.constant 0 : index
    %c0_58 = arith.constant 0 : index
    %97 = vector.load %arg23[%c0_57, %c0_58] : memref<32x32xf32, #tpu.memory_space<vmem>>, vector<32x32xf32>
    %cst_59 = arith.constant dense<0.000000e+00> : vector<4x32xf32>
    %98 = tpu.matmul %96, %97, %cst_59 {dimension_numbers = #tpu.dot_dimension_numbers<[1], [0], [0], [1], [0, 0, 1, 1], [], []>} : vector<4x32xf32>, vector<32x32xf32>, vector<4x32xf32> -> vector<4x32xf32>
    %99 = arith.divf %96, %98 : vector<4x32xf32>
    %c0_60 = arith.constant 0 : index
    %c0_61 = arith.constant 0 : index
    %100 = vector.load %arg9[%c0_60, %c0_61] : memref<32x128xf32, #tpu.memory_space<vmem>>, vector<32x128xf32>
    %cst_62 = arith.constant dense<0.000000e+00> : vector<4x128xf32>
    %101 = tpu.matmul %0, %100, %cst_62 {dimension_numbers = #tpu.dot_dimension_numbers<[1], [0], [0], [1], [0, 0, 1, 1], [], []>} : vector<4x32xf32>, vector<32x128xf32>, vector<4x128xf32> -> vector<4x128xf32>
    %c0_63 = arith.constant 0 : index
    %c0_64 = arith.constant 0 : index
    %102 = vector.load %arg10[%c0_63, %c0_64] : memref<16x128xf32, #tpu.memory_space<vmem>>, vector<16x128xf32>
    %cst_65 = arith.constant dense<0.000000e+00> : vector<4x128xf32>
    %103 = tpu.matmul %93, %102, %cst_65 {dimension_numbers = #tpu.dot_dimension_numbers<[1], [0], [0], [1], [0, 0, 1, 1], [], []>} : vector<4x16xf32>, vector<16x128xf32>, vector<4x128xf32> -> vector<4x128xf32>
    %104 = arith.addf %101, %103 : vector<4x128xf32>
    %c0_66 = arith.constant 0 : index
    %c0_67 = arith.constant 0 : index
    %105 = vector.load %arg11[%c0_66, %c0_67] : memref<1x128xf32, #tpu.memory_space<vmem>>, vector<1x128xf32>
    %106 = vector.broadcast %105 : vector<1x128xf32> to vector<4x128xf32>
    %107 = arith.addf %104, %106 : vector<4x128xf32>
    %108 = arith.negf %107 : vector<4x128xf32>
    %109 = math.exp %108 : vector<4x128xf32>
    %cst_68 = arith.constant 1.000000e+00 : f32
    %110 = vector.broadcast %cst_68 : f32 to vector<4x128xf32>
    %111 = arith.addf %110, %109 : vector<4x128xf32>
    %112 = arith.divf %110, %111 : vector<4x128xf32>
    %113 = vector.extract_strided_slice %112 {offsets = [0, 0], sizes = [4, 32], strides = [1, 1]} : vector<4x128xf32> to vector<4x32xf32>
    %114 = vector.extract_strided_slice %112 {offsets = [0, 32], sizes = [4, 32], strides = [1, 1]} : vector<4x128xf32> to vector<4x32xf32>
    %115 = vector.extract_strided_slice %107 {offsets = [0, 64], sizes = [4, 32], strides = [1, 1]} : vector<4x128xf32> to vector<4x32xf32>
    %116 = math.tanh %115 : vector<4x32xf32>
    %117 = arith.mulf %114, %99 : vector<4x32xf32>
    %118 = arith.mulf %113, %116 : vector<4x32xf32>
    %119 = arith.addf %117, %118 : vector<4x32xf32>
    %c0_69 = arith.constant 0 : index
    %c0_70 = arith.constant 0 : index
    %120 = vector.load %arg24[%c0_69, %c0_70] : memref<4x32xf32, #tpu.memory_space<vmem>>, vector<4x32xf32>
    tpu.vector_store %arg24[%c0_69, %c0_70], %119 {strides = array<i32>} : memref<4x32xf32, #tpu.memory_space<vmem>>, vector<4x32xf32>,
    return
  }
}

</mosaic_0001>

<bundles_post_ra>
// kernel: fwd_lstm_pallas.1
= control target key start
LH: loop header
LB: loop body
LE: loop exit
PB: predicated region body
PF: predicated region fallthrough
CT: control target
= control target key end

     0   :  { %s2988_s0 = inlined_call_operand.hbm [shape: f32[4,32], index: 0, kind: input, shape index: {}]   ;;  %s2989_s1 = inlined_call_operand.vmem [shape: f32[32,128], index: 1, kind: input, shape index: {}]   ;;  %s2990_s2 = inlined_call_operand.vmem [shape: f32[1,128], index: 2, kind: input, shape index: {}]   ;;  %s2991_s3 = inlined_call_operand.vmem [shape: f32[32,128], index: 3, kind: input, shape index: {}]   ;;  %s2992_s4 = inlined_call_operand.hbm [shape: f32[16,128], index: 4, kind: input, shape index: {}]   ;;  %s2993_s5 = inlined_call_operand.vmem [shape: f32[1,128], index: 5, kind: input, shape index: {}]   ;;  %s2994_s6 = inlined_call_operand.vmem [shape: f32[32,128], index: 6, kind: input, shape index: {}]   ;;  %s2995_s7 = inlined_call_operand.hbm [shape: f32[16,128], index: 7, kind: input, shape index: {}]   ;;  %s2996_s8 = inlined_call_operand.vmem [shape: f32[1,128], index: 8, kind: input, shape index: {}]   ;;  %s2997_s9 = inlined_call_operand.vmem [shape: f32[32,128], index: 9, kind: input, shape index: {}]   ;;  %s2998_s10 = inlined_call_operand.hbm [shape: f32[16,128], index: 10, kind: input, shape index: {}]   ;;  %s2999_s11 = inlined_call_operand.vmem [shape: f32[1,128], index: 11, kind: input, shape index: {}]   ;;  %s3000_s12 = inlined_call_operand.vmem [shape: f32[32,16], index: 12, kind: input, shape index: {}]   ;;  %s3001_s13 = inlined_call_operand.hbm [shape: f32[32,32], index: 13, kind: input, shape index: {}]   ;;  %s3002_s14 = inlined_call_operand.vmem [shape: f32[32,16], index: 14, kind: input, shape index: {}]   ;;  %s3003_s15 = inlined_call_operand.hbm [shape: f32[32,32], index: 15, kind: input, shape index: {}]   ;;  %s3004_s16 = inlined_call_operand.vmem [shape: f32[32,16], index: 16, kind: input, shape index: {}]   ;;  %s3005_s17 = inlined_call_operand.hbm [shape: f32[32,32], index: 17, kind: input, shape index: {}]   ;;  %s3006_s18 = inlined_call_operand.hbm [shape: f32[16,16], index: 18, kind: input, shape index: {}]   ;;  %s3007_s19 = inlined_call_operand.hbm [shape: f32[32,32], index: 19, kind: input, shape index: {}]   ;;  %s3008_s20 = inlined_call_operand.hbm [shape: f32[16,16], index: 20, kind: input, shape index: {}]   ;;  %s3009_s21 = inlined_call_operand.vmem [shape: f32[32,32], index: 21, kind: input, shape index: {}]   ;;  %s3010_s22 = inlined_call_operand.hbm [shape: f32[16,16], index: 22, kind: input, shape index: {}]   ;;  %s3011_s23 = inlined_call_operand.hbm [shape: f32[32,32], index: 23, kind: input, shape index: {}]   ;;  %s3012_s24 = inlined_call_operand.hbm [shape: f32[4,32], index: 24, kind: output, shape index: {}]  }
   0x1   :  { %3016 = sst [smem:[#allocation31_spill]] %s2988_s0 }
   0x2   :  { %3017 = sst [smem:[#allocation32_spill]] %s2989_s1 }
   0x3   :  { %3018 = sst [smem:[#allocation33_spill]] %s2990_s2 }
   0x4   :  { %3019 = sst [smem:[#allocation34_spill]] %s2991_s3 }
   0x5   :  { %3020 = sst [smem:[#allocation35_spill]] %s2992_s4 }
   0x6   :  { %3021 = sst [smem:[#allocation36_spill]] %s2993_s5 }
   0x7   :  { %3022 = sst [smem:[#allocation37_spill]] %s2994_s6 }
   0x8   :  { %3023 = sst [smem:[#allocation38_spill]] %s2995_s7 }
   0x9   :  { %3024 = sst [smem:[#allocation39_spill]] %s2996_s8 }
   0xa   :  { %29 = vsyncpa [#allocation3], 0 }
   0xb   :  { %30 = vsyncpa [#allocation6], 0 }
   0xc   :  { %31 = vsyncpa [#allocation9], 0 }
   0xd   :  { %32 = vsyncpa [#allocation12], 0 }
   0xe   :  { %33 = vsyncpa [#allocation15], 0 }
   0xf   :  { %34 = vsyncpa [#allocation18], 0 }
  0x10   :  { %35 = vsyncpa [#allocation21], 0 }
  0x11   :  { %36 = vsyncpa [#allocation4], 0  ;;  %s2517_s5 = smov [#allocation5]  }
  0x12   :  { %s58_s26 = sshll.u32 %s2517_s5, 4  ;;  %s59_s26 = int_to_ptr.vmem [resolvable:$true] %s58_s26 }
  0x13   :  { %s2249_s27 = scalar_lea.vmem %s59_s26, 256  ;;  %p2254_p1 = scmp.lt.s32.totalorder %s59_s26, %s59_s26 }
  0x14   :  { %p2250_p0 = scmp.ne.s32.totalorder %s59_s26, %s2249_s27  ;;  %p2255_p2 = scmp.lt.s32.totalorder %s2249_s27, %s2249_s27 }
  0x16   :  { %p2256_p3 = por %p2255_p2, %p2254_p1 }
  0x18   :  { %p2257_p4 = pnand %p2256_p3, %p2250_p0 }
  0x1a   :  { %2260 = shalt.err (!%p2257_p4)
}
  0x1b   :  { %s2518_s28 = smov 128   ;;  %s2519_s6 = smov 8  }
  0x1c   :  { %s3025_s0 = sld [smem:[#allocation35_spill]]  ;;  %s2520_s7 = smov [#allocation8]  }
  0x1d   :  { %s90_s30 = sshll.u32 %s2520_s7, 4  ;;  %s2521_s3 = smov [#allocation11]   ;;  %s91_s30 = int_to_ptr.vmem [resolvable:$true] %s90_s30 }
  0x1e   :  { %s120_s25 = sshll.u32 %s2521_s3, 4  ;;  %s2269_s8 = scalar_lea.vmem %s91_s30, 256  ;;  %s121_s25 = int_to_ptr.vmem [resolvable:$true] %s120_s25 }
  0x1f   :  { %p2270_p5 = scmp.ne.s32.totalorder %s91_s30, %s2269_s8  ;;  %p2274_p6 = scmp.lt.s32.totalorder %s91_s30, %s91_s30 }
  0x20   :  { %p2275_p7 = scmp.lt.s32.totalorder %s2269_s8, %s2269_s8 }
  0x22   :  { %64 = dma.hbm_to_vmem [thread:$0]  %s3025_s0, 256, %s59_s26, [#allocation6], %s2518_s28, %s2518_s28, %s2519_s6  }
  0x23   :  { %p2276_p8 = por %p2275_p7, %p2274_p6 }
  0x25   :  { %p2277_p9 = pnand %p2276_p8, %p2270_p5 }
  0x27   :  { %2280 = shalt.err (!%p2277_p9)
}
  0x28   :  { %96 = dma.hbm_to_vmem [thread:$0]  %s2998_s10, 256, %s91_s30, [#allocation9], %s2518_s28, %s2518_s28, %s2519_s6  }
  0x29   :  { %s2289_s5 = scalar_lea.vmem %s121_s25, 512  ;;  %p2294_p11 = scmp.lt.s32.totalorder %s121_s25, %s121_s25 }
  0x2a   :  { %p2290_p10 = scmp.ne.s32.totalorder %s121_s25, %s2289_s5  ;;  %p2295_p12 = scmp.lt.s32.totalorder %s2289_s5, %s2289_s5 }
  0x2c   :  { %p2296_p13 = por %p2295_p12, %p2294_p11 }
  0x2e   :  { %p2297_p0 = pnand %p2296_p13, %p2290_p10 }
  0x30   :  { %2300 = shalt.err (!%p2297_p0)
}
  0x31   :  { %126 = dma.hbm_to_vmem [thread:$0]  %s3003_s15, 512, %s121_s25, [#allocation12], %s2518_s28, %s2518_s28, %s2519_s6  }
  0x32   :  { %s2522_s2 = smov [#allocation14]   ;;  %s2523_s0 = smov [#allocation17]  }
  0x33   :  { %s146_s29 = sshll.u32 %s2522_s2, 4  ;;  %s170_s10 = sshll.u32 %s2523_s0, 4  ;;  %s147_s29 = int_to_ptr.vmem [resolvable:$true] %s146_s29  ;;  %s171_s10 = int_to_ptr.vmem [resolvable:$true] %s170_s10 }
  0x34   :  { %s2309_s7 = scalar_lea.vmem %s147_s29, 256  ;;  %p2314_p2 = scmp.lt.s32.totalorder %s147_s29, %s147_s29 }
  0x35   :  { %p2310_p1 = scmp.ne.s32.totalorder %s147_s29, %s2309_s7  ;;  %p2315_p3 = scmp.lt.s32.totalorder %s2309_s7, %s2309_s7 }
  0x37   :  { %p2316_p4 = por %p2315_p3, %p2314_p2 }
  0x39   :  { %p2317_p5 = pnand %p2316_p4, %p2310_p1 }
  0x3b   :  { %2320 = shalt.err (!%p2317_p5)
}
  0x3c   :  { %152 = dma.hbm_to_vmem [thread:$0]  %s3006_s18, 256, %s147_s29, [#allocation15], %s2518_s28, %s2518_s28, %s2519_s6  }
  0x3d   :  { %s2329_s15 = scalar_lea.vmem %s171_s10, 256  ;;  %p2334_p7 = scmp.lt.s32.totalorder %s171_s10, %s171_s10 }
  0x3e   :  { %p2330_p6 = scmp.ne.s32.totalorder %s171_s10, %s2329_s15  ;;  %p2335_p8 = scmp.lt.s32.totalorder %s2329_s15, %s2329_s15 }
  0x40   :  { %p2336_p9 = por %p2335_p8, %p2334_p7 }
  0x42   :  { %p2337_p10 = pnand %p2336_p9, %p2330_p6 }
  0x44   :  { %2340 = shalt.err (!%p2337_p10)
}
  0x45   :  { %176 = dma.hbm_to_vmem [thread:$0]  %s3008_s20, 256, %s171_s10, [#allocation18], %s2518_s28, %s2518_s28, %s2519_s6  }
  0x46   :  { %s2524_s4 = smov [#allocation2]   ;;  %s2525_s5 = smov [#allocation7]  }
  0x47   :  { %s43_s1 = sshll.u32 %s2524_s4, 4  ;;  %s74_s18 = sshll.u32 %s2525_s5, 4  ;;  %s44_s1 = int_to_ptr.vmem [resolvable:$true] %s43_s1  ;;  %s75_s18 = int_to_ptr.vmem [resolvable:$true] %s74_s18 }
  0x48   :  { %s2349_s26 = scalar_lea.vmem %s44_s1, 64  ;;  %p2354_p12 = scmp.lt.s32.totalorder %s44_s1, %s44_s1 }
  0x49   :  { %p2350_p11 = scmp.ne.s32.totalorder %s44_s1, %s2349_s26  ;;  %p2355_p13 = scmp.lt.s32.totalorder %s2349_s26, %s2349_s26 }
  0x4b   :  { %p2356_p0 = por %p2355_p13, %p2354_p12 }
  0x4d   :  { %p2357_p1 = pnand %p2356_p0, %p2350_p11 }
  0x4f   :  { %2360 = shalt.err (!%p2357_p1)
}
  0x50   :  { %s3026_s29 = sld [smem:[#allocation31_spill]]  ;;  %s2369_s0 = scalar_lea.vmem %s75_s18, 256 }
  0x51   :  { %p2370_p2 = scmp.ne.s32.totalorder %s75_s18, %s2369_s0  ;;  %p2374_p3 = scmp.lt.s32.totalorder %s75_s18, %s75_s18 }
  0x52   :  { %p2375_p4 = scmp.lt.s32.totalorder %s2369_s0, %s2369_s0 }
  0x54   :  { %p2376_p5 = por %p2375_p4, %p2374_p3 }
  0x56   :  { %46 = dma.hbm_to_vmem [thread:$0]  %s3026_s29, 64, %s44_s1, [#allocation3]  }
  0x57   :  { %p2377_p6 = pnand %p2376_p5, %p2370_p2 }
  0x59   :  { %2380 = shalt.err (!%p2377_p6)
}
  0x5a   :  { %s3027_s7 = sld [smem:[#allocation38_spill]]  ;;  %s2526_s30 = smov [#allocation10]  }
  0x5b   :  { %s106_s3 = sshll.u32 %s2526_s30, 4  ;;  %s2527_s15 = smov [#allocation13]   ;;  %s107_s3 = int_to_ptr.vmem [resolvable:$true] %s106_s3 }
  0x5c   :  { %s134_s25 = sshll.u32 %s2527_s15, 4  ;;  %s2389_s8 = scalar_lea.vmem %s107_s3, 512  ;;  %s135_s25 = int_to_ptr.vmem [resolvable:$true] %s134_s25 }
  0x5d   :  { %p2390_p7 = scmp.ne.s32.totalorder %s107_s3, %s2389_s8  ;;  %p2394_p8 = scmp.lt.s32.totalorder %s107_s3, %s107_s3 }
  0x5e   :  { %p2395_p9 = scmp.lt.s32.totalorder %s2389_s8, %s2389_s8 }
  0x60   :  { %80 = dma.hbm_to_vmem [thread:$0]  %s3027_s7, 256, %s75_s18, [#allocation6], %s2518_s28, %s2518_s28, %s2519_s6  }
  0x61   :  { %p2396_p10 = por %p2395_p9, %p2394_p8 }
  0x63   :  { %p2397_p11 = pnand %p2396_p10, %p2390_p7 }
  0x65   :  { %2400 = shalt.err (!%p2397_p11)
}
  0x66   :  { %112 = dma.hbm_to_vmem [thread:$0]  %s3001_s13, 512, %s107_s3, [#allocation9], %s2518_s28, %s2518_s28, %s2519_s6  }
  0x67   :  { %s2409_s5 = scalar_lea.vmem %s135_s25, 512  ;;  %p2414_p13 = scmp.lt.s32.totalorder %s135_s25, %s135_s25 }
  0x68   :  { %p2410_p12 = scmp.ne.s32.totalorder %s135_s25, %s2409_s5  ;;  %p2415_p0 = scmp.lt.s32.totalorder %s2409_s5, %s2409_s5 }
  0x6a   :  { %p2416_p1 = por %p2415_p0, %p2414_p13 }
  0x6c   :  { %p2417_p2 = pnand %p2416_p1, %p2410_p12 }
  0x6e   :  { %2420 = shalt.err (!%p2417_p2)
}
  0x6f   :  { %140 = dma.hbm_to_vmem [thread:$0]  %s3005_s17, 512, %s135_s25, [#allocation12], %s2518_s28, %s2518_s28, %s2519_s6  }
  0x70   :  { %s2528_s27 = smov [#allocation16]   ;;  %s2529_s29 = smov [#allocation19]  }
  0x71   :  { %s158_s2 = sshll.u32 %s2528_s27, 4  ;;  %s184_s13 = sshll.u32 %s2529_s29, 4  ;;  %s159_s2 = int_to_ptr.vmem [resolvable:$true] %s158_s2  ;;  %s185_s13 = int_to_ptr.vmem [resolvable:$true] %s184_s13 }
  0x72   :  { %s2429_s0 = scalar_lea.vmem %s159_s2, 512  ;;  %p2434_p4 = scmp.lt.s32.totalorder %s159_s2, %s159_s2 }
  0x73   :  { %p2430_p3 = scmp.ne.s32.totalorder %s159_s2, %s2429_s0  ;;  %p2435_p5 = scmp.lt.s32.totalorder %s2429_s0, %s2429_s0 }
  0x75   :  { %p2436_p6 = por %p2435_p5, %p2434_p4 }
  0x77   :  { %p2437_p7 = pnand %p2436_p6, %p2430_p3 }
  0x79   :  { %2440 = shalt.err (!%p2437_p7)
}
  0x7a   :  { %164 = dma.hbm_to_vmem [thread:$0]  %s3007_s19, 512, %s159_s2, [#allocation15], %s2518_s28, %s2518_s28, %s2519_s6  }
  0x7b   :  { %s2449_s17 = scalar_lea.vmem %s185_s13, 256  ;;  %p2454_p9 = scmp.lt.s32.totalorder %s185_s13, %s185_s13 }
  0x7c   :  { %p2450_p8 = scmp.ne.s32.totalorder %s185_s13, %s2449_s17  ;;  %p2455_p10 = scmp.lt.s32.totalorder %s2449_s17, %s2449_s17 }
  0x7e   :  { %p2456_p11 = por %p2455_p10, %p2454_p9 }
  0x80   :  { %p2457_p12 = pnand %p2456_p11, %p2450_p8 }
  0x82   :  { %2460 = shalt.err (!%p2457_p12)
}
  0x83   :  { %190 = dma.hbm_to_vmem [thread:$0]  %s3010_s22, 256, %s185_s13, [#allocation18], %s2518_s28, %s2518_s28, %s2519_s6  }
  0x84   :  { %s2530_s3 = smov [#allocation20]  }
  0x85   :  { %s196_s15 = sshll.u32 %s2530_s3, 4  ;;  %s197_s15 = int_to_ptr.vmem [resolvable:$true] %s196_s15 }
  0x86   :  { %s2469_s25 = scalar_lea.vmem %s197_s15, 512  ;;  %p2474_p0 = scmp.lt.s32.totalorder %s197_s15, %s197_s15 }
  0x87   :  { %p2470_p13 = scmp.ne.s32.totalorder %s197_s15, %s2469_s25  ;;  %p2475_p1 = scmp.lt.s32.totalorder %s2469_s25, %s2469_s25 }
  0x89   :  { %p2476_p2 = por %p2475_p1, %p2474_p0 }
  0x8b   :  { %p2477_p3 = pnand %p2476_p2, %p2470_p13 }
  0x8d   :  { %2480 = shalt.err (!%p2477_p3)
}
  0x8e   :  { %202 = dma.hbm_to_vmem [thread:$0]  %s3011_s23, 512, %s197_s15, [#allocation21], %s2518_s28, %s2518_s28, %s2519_s6  }
  0x8f   :  { %2501 = dma.done.wait [#allocation3], 64  }
  0x90   :  { %2502 = vsyncadd [#allocation3], 4294967232 }
  0x91   :  { %2503 = dma.done.wait [#allocation6], 512  }
  0x92   :  { %2504 = vsyncadd [#allocation6], 4294966784 }
  0x93   :  { %2505 = dma.done.wait [#allocation9], 768  }
  0x94   :  { %2506 = vsyncadd [#allocation9], 4294966528 }
  0x95   :  { %2507 = dma.done.wait [#allocation12], 1024  }
  0x96   :  { %2508 = vsyncadd [#allocation12], 4294966272 }
  0x97   :  { %2509 = dma.done.wait [#allocation15], 768  }
  0x98   :  { %2510 = vsyncadd [#allocation15], 4294966528 }
  0x99   :  { %2511 = dma.done.wait [#allocation18], 512  }
  0x9a   :  { %2512 = vsyncadd [#allocation18], 4294966784 }
  0x9b   :  { %2513 = dma.done.wait [#allocation21], 512  }
  0x9c   :  { %2514 = vsyncadd [#allocation21], 4294966784  ;;  %v2531_v0 = vmov 0.0   ;;  %vm2532_vm0 = vmmov 0   ;;  %s3028_s28 = sld [smem:[#allocation32_spill]]  ;;  %vm251_vm1 = vcmask 261120  }
  0x9d   :  { %1982 = vmatprep.subr.mxu0 %v2531_v0  ;;  %1990 = vmatprep.mubr.msk.f32.mxu0 %vm2532_vm0, %v2531_v0  ;;  %v2751_v5 = vld [vmem:[#allocation2] sm:$0xf]  ;;  %s3029_s29 = sld [smem:[#allocation33_spill]]  ;;  %s2533_s13 = smov 64   ;;  %v346_v17 = vld [vmem:[%s3000_s12 + $0x18] sm:$0xff]  ;;  %v345_v18 = vld [vmem:[%s3000_s12 + $0x10] sm:$0xff] }
  0x9e   :  { %1993 = vmatprep.subr.mxu1 %v2531_v0  ;;  %2001 = vmatprep.mubr.msk.f32.mxu1 %vm2532_vm0, %v2531_v0  ;;  %v344_v19 = vld [vmem:[%s3000_s12 + $0x8] sm:$0xff]  ;;  %v343_v20 = vld [vmem:[%s3000_s12] sm:$0xff]  ;;  %s2534_s25 = smov 96   ;;  %s2535_s19 = smov 32   ;;  %v424_v26 = vld [vmem:[#allocation14] sm:$0xff]  ;;  %vm426_vm2 = vcmask 130048  }
  0x9f   :  { %1994 = vmatpush3.msra.mxu1 %v346_v17  ;;  %v425_v25 = vld [vmem:[#allocation14 + $0x8] sm:$0xff]  ;;  %v505_v30 = vld [vmem:[#allocation10 + $0x18] sm:$0xff]  ;;  %v504_v32 = vld [vmem:[#allocation10 + $0x10] sm:$0xff]  ;;  %s3030_s22 = sld [smem:[#allocation34_spill]]  ;;  %vm1849_vm3 = vcmask 257024  }
  0xa0   :  { %1995 = vmatprep.subr.mxu1 %v2531_v0  ;;  %v503_v33 = vld [vmem:[#allocation10 + $0x8] sm:$0xff]  ;;  %v502_v34 = vld [vmem:[#allocation10] sm:$0xff]  ;;  %v665_v35 = vld [vmem:[#allocation5 + $0x8] sm:$0xff]  ;;  %s3031_s27 = sld [smem:[#allocation36_spill]] }
  0xa1   :  { %1996 = vmatpush3.msra.mxu1 %v345_v18  ;;  %v584_v36 = vld [vmem:[#allocation16 + $0x18] sm:$0xff]  ;;  %v664_v37 = vld [vmem:[#allocation5] sm:$0xff]  ;;  %v583_v38 = vld [vmem:[#allocation16 + $0x10] sm:$0xff]  ;;  %s3032_s1 = sld [smem:[#allocation37_spill]] }
  0xa2   :  { %v243_v1 = vld [vmem:[%s3028_s28 + $0x18] sm:$0xff]  ;;  %v242_v2 = vld [vmem:[%s3028_s28 + $0x10] sm:$0xff]  ;;  %v241_v3 = vld [vmem:[%s3028_s28 + $0x8] sm:$0xff]  ;;  %1997 = vmatprep.subr.mxu1 %v2531_v0  ;;  %s3033_s20 = sld [smem:[#allocation39_spill]] }
  0xa3   :  { %1983 = vmatpush3.msra.mxu0 %v243_v1  ;;  %v240_v4 = vld [vmem:[%s3028_s28] sm:$0xff]  ;;  %1998 = vmatpush3.msra.mxu1 %v344_v19  ;;  %v582_v39 = vld [vmem:[#allocation16 + $0x8] sm:$0xff] }
  0xa4   :  { %1984 = vmatprep.subr.mxu0 %v2531_v0  ;;  %v1872_v6 = vld [vmem:[%s3029_s29] ss:$0 sm:$0xff]  ;;  %1999 = vmatprep.subr.mxu1 %v2531_v0  ;;  %v581_v40 = vld [vmem:[#allocation16] sm:$0xff] }
  0xa5   :  { %1985 = vmatpush3.msra.mxu0 %v242_v2  ;;  %2000 = vmatpush3.msra.mxu1 %v343_v20  ;;  %v663_v48 = vld [vmem:[%s3030_s22 + $0x18] sm:$0xff]  ;;  %v662_v50 = vld [vmem:[%s3030_s22 + $0x10] sm:$0xff]  ;;  %v661_v51 = vld [vmem:[%s3030_s22 + $0x8] sm:$0xff] }
  0xa6   :  { %1986 = vmatprep.subr.mxu0 %v2531_v0  ;;  %2004 = vmatprep.subr.mxu1 %v2531_v0  ;;  %v660_v52 = vld [vmem:[%s3030_s22] sm:$0xff]  ;;  %v1006_v20 = vld [vmem:[#allocation11 + $0x18] sm:$0xff] }
  0xa7   :  { %1987 = vmatpush3.msra.mxu0 %v241_v3  ;;  %v1881_v58 = vld [vmem:[%s3031_s27] ss:$0 sm:$0xff] }
  0xa8   :  { %1988 = vmatprep.subr.mxu0 %v2531_v0 }
  0xa9   :  { %1989 = vmatpush3.msra.mxu0 %v240_v4 }
  0xaa   :  { %1991 = vmatmul.mubr.msk.f32.vlgmr.msra.gmra.mxu0 %vm251_vm1, %v2751_v5  ;;  %2022 = vmatprep.subr.mxu0 %v2531_v0 }
  0xab   :  { %2030 = vmatprep.mubr.msk.f32.mxu0 %vm2532_vm0, %v2531_v0  ;;  %2023 = vmatpush3.msra.mxu0 %v584_v36  ;;  %v1086_v36 = vld [vmem:[%s3009_s21 + $0x10] sm:$0xff] }
  0xac   :  { %2024 = vmatprep.subr.mxu0 %v2531_v0 }
  0xad   :  { %2025 = vmatpush3.msra.mxu0 %v583_v38  ;;  %v1084_v38 = vld [vmem:[%s3009_s21] sm:$0xff] }
  0xae   :  { %2026 = vmatprep.subr.mxu0 %v2531_v0 }
  0xaf   :  { %2027 = vmatpush3.msra.mxu0 %v582_v39 }
  0xb0   :  { %2028 = vmatprep.subr.mxu0 %v2531_v0 }
  0xb1   :  { %2029 = vmatpush3.msra.mxu0 %v581_v40  ;;  %v1166_v40 = vld [vmem:[%s3032_s1 + $0x18] sm:$0xff] }
  0xb2   :  { %2040 = vmatprep.subr.mxu0 %v2531_v0 }
 0x16a   :  { %v321_v7 = vpop.f32.mrf.mxu0 }
 0x16b   :  { %v322_v8 = vadd.f32 %v1872_v6, %v321_v7 }
 0x16c   :  { %v1992_v9 = vpop.f32.mrf.mxu0 }
 0x16d   :  { %2187 = vtanh.f32 %v322_v8  ;;  %v1874_v11 = vmul.f32 -1.442695, %v322_v8 }
 0x16f   :  { %2189 = vpow2.f32 %v1874_v11 }
 0x17a   :  { %v2188_v10 = vpop.eup %2187 }
 0x17b   :  { %333 = vrot.lane.b32.xlu0 %v2188_v10, %s2533_s13 }
 0x17c   :  { %v2190_v12 = vpop.eup %2189 }
 0x17d   :  { %v328_v13 = vadd.f32 1.0, %v2190_v12 }
 0x17f   :  { %2191 = vrcp.f32 %v328_v13  ;;  %v848_v13 = vld [vmem:[%s3002_s14 + $0x18] sm:$0xff] }
 0x18c   :  { %v2192_v14 = vpop.eup %2191 }
 0x1ed   :  { %v334_v15 = vpop.permute.xlu0 %333 }
 0x1ee   :  { %v336_v16 = vmul.f32 %v2192_v14, %v334_v15  ;;  %v846_v15 = vld [vmem:[%s3002_s14 + $0x8] sm:$0xff] }
 0x1f0   :  { %2193 = vtanh.f32 %v336_v16 }
 0x1fd   :  { %v2194_v21 = vpop.eup %2193 }
 0x1fe   :  { %339 = vrot.lane.b32.xlu0 %v2194_v21, %s2534_s25 }
 0x270   :  { %v340_v22 = vpop.permute.xlu0 %339 }
 0x271   :  { %v342_v23 = vmul.f32 %v2192_v14, %v340_v22  ;;  %v847_v14 = vld [vmem:[%s3002_s14 + $0x10] sm:$0xff]  ;;  %v1005_v22 = vld [vmem:[#allocation11 + $0x10] sm:$0xff] }
 0x273   :  { %348 = vrot.lane.b32.xlu1 %v342_v23, %s2535_s19  ;;  %v1004_v23 = vld [vmem:[#allocation11 + $0x8] sm:$0xff] }
 0x2e5   :  { %v349_v24 = vpop.permute.xlu1 %348 }
 0x2e6   :  { %2002 = vmatmul.mubr.msk.f32.vlgmr.msra.gmra.mxu1 %vm251_vm1, %v349_v24  ;;  %v1003_v24 = vld [vmem:[#allocation11] sm:$0xff] }
 0x2e7   :  { %2008 = vmatprep.mubr.msk.f32.mxu1 %vm2532_vm0, %v2531_v0  ;;  %2005 = vmatpush3.msra.mxu1 %v425_v25 }
 0x2e8   :  { %2006 = vmatprep.subr.mxu1 %v2531_v0 }
 0x2e9   :  { %2007 = vmatpush3.msra.mxu1 %v424_v26  ;;  %v927_v26 = vld [vmem:[#allocation17 + $0x8] sm:$0xff] }
 0x2ea   :  { %2011 = vmatprep.subr.mxu1 %v2531_v0 }
 0x3a6   :  { %v418_v27 = vpop.f32.mrf.mxu1 }
 0x3a7   :  { %v422_v28 = vmul.f32 1.442695, %v418_v27  ;;  %v926_v27 = vld [vmem:[#allocation17] sm:$0xff] }
 0x3a8   :  { %v2003_v29 = vpop.f32.mrf.mxu1 }
 0x3a9   :  { %2195 = vpow2.f32 %v422_v28 }
 0x3b6   :  { %v2196_v31 = vpop.eup %2195 }
 0x3b7   :  { %2009 = vmatmul.mubr.msk.f32.vlgmr.msra.gmra.mxu1 %vm426_vm2, %v2196_v31 }
 0x3b8   :  { %2012 = vmatpush3.msra.mxu1 %v505_v30  ;;  %2019 = vmatprep.mubr.msk.f32.mxu1 %vm2532_vm0, %v2531_v0 }
 0x3b9   :  { %2013 = vmatprep.subr.mxu1 %v2531_v0 }
 0x3ba   :  { %2014 = vmatpush3.msra.mxu1 %v504_v32 }
 0x3bb   :  { %2015 = vmatprep.subr.mxu1 %v2531_v0 }
 0x3bc   :  { %2016 = vmatpush3.msra.mxu1 %v503_v33 }
 0x3bd   :  { %2017 = vmatprep.subr.mxu1 %v2531_v0 }
 0x3be   :  { %2018 = vmatpush3.msra.mxu1 %v502_v34  ;;  %v1087_v34 = vld [vmem:[%s3009_s21 + $0x18] sm:$0xff] }
 0x3bf   :  { %2020 = vmatmul.mubr.msk.f32.vlgmr.msra.gmra.mxu1 %vm251_vm1, %v336_v16  ;;  %2033 = vmatprep.subr.mxu1 %v2531_v0  ;;  %v845_v16 = vld [vmem:[%s3002_s14] sm:$0xff] }
 0x3c0   :  { %2037 = vmatprep.mubr.msk.f32.mxu1 %vm2532_vm0, %v2531_v0  ;;  %2034 = vmatpush3.msra.mxu1 %v665_v35 }
 0x3c1   :  { %2035 = vmatprep.subr.mxu1 %v2531_v0 }
 0x3c2   :  { %2036 = vmatpush3.msra.mxu1 %v664_v37  ;;  %v1085_v37 = vld [vmem:[%s3009_s21 + $0x8] sm:$0xff] }
 0x3c3   :  { %2051 = vmatprep.subr.mxu1 %v2531_v0 }
 0x477   :  { %v496_v41 = vpop.f32.mrf.mxu1 }
 0x478   :  { %2197 = vrcp.f32 %v496_v41  ;;  %v1165_v41 = vld [vmem:[%s3032_s1 + $0x10] sm:$0xff] }
 0x479   :  { %v2010_v42 = vpop.f32.mrf.mxu1 }
 0x47a   :  { %v1164_v42 = vld [vmem:[%s3032_s1 + $0x8] sm:$0xff] }
 0x47f   :  { %v575_v43 = vpop.f32.mrf.mxu1 }
 0x480   :  { %v579_v44 = vmul.f32 1.442695, %v575_v43  ;;  %v1168_v43 = vld [vmem:[#allocation7 + $0x8] sm:$0xff] }
 0x481   :  { %v2021_v45 = vpop.f32.mrf.mxu1 }
 0x482   :  { %2199 = vpow2.f32 %v579_v44  ;;  %v1167_v44 = vld [vmem:[#allocation7] sm:$0xff]  ;;  %v1163_v45 = vld [vmem:[%s3032_s1] sm:$0xff] }
 0x485   :  { %v2198_v46 = vpop.eup %2197 }
 0x486   :  { %v501_v47 = vmul.f32 %v2198_v46, %v2196_v31 }
 0x488   :  { %2038 = vmatmul.mubr.msk.f32.vlgmr.msra.gmra.mxu1 %vm426_vm2, %v501_v47 }
 0x489   :  { %2059 = vmatprep.mubr.msk.f32.mxu1 %vm2532_vm0, %v2531_v0  ;;  %2052 = vmatpush3.msra.mxu1 %v848_v13  ;;  %v1348_v13 = vld [vmem:[%s3004_s16] sm:$0xff] }
 0x48a   :  { %2053 = vmatprep.subr.mxu1 %v2531_v0 }
 0x48b   :  { %2054 = vmatpush3.msra.mxu1 %v847_v14 }
 0x48c   :  { %2055 = vmatprep.subr.mxu1 %v2531_v0 }
 0x48d   :  { %2056 = vmatpush3.msra.mxu1 %v846_v15 }
 0x48e   :  { %2057 = vmatprep.subr.mxu1 %v2531_v0 }
 0x48f   :  { %v2200_v49 = vpop.eup %2199  ;;  %2058 = vmatpush3.msra.mxu1 %v845_v16 }
 0x490   :  { %2031 = vmatmul.mubr.msk.f32.vlgmr.msra.gmra.mxu0 %vm251_vm1, %v2200_v49  ;;  %2069 = vmatprep.subr.mxu1 %v2531_v0 }
 0x491   :  { %2041 = vmatpush3.msra.mxu0 %v663_v48  ;;  %2048 = vmatprep.mubr.msk.f32.mxu0 %vm2532_vm0, %v2531_v0 }
 0x492   :  { %2042 = vmatprep.subr.mxu0 %v2531_v0 }
 0x493   :  { %2043 = vmatpush3.msra.mxu0 %v662_v50 }
 0x494   :  { %2044 = vmatprep.subr.mxu0 %v2531_v0 }
 0x495   :  { %2045 = vmatpush3.msra.mxu0 %v661_v51 }
 0x496   :  { %2046 = vmatprep.subr.mxu0 %v2531_v0 }
 0x497   :  { %2047 = vmatpush3.msra.mxu0 %v660_v52 }
 0x498   :  { %2049 = vmatmul.mubr.msk.f32.vlgmr.msra.gmra.mxu0 %vm251_vm1, %v2751_v5  ;;  %2062 = vmatprep.subr.mxu0 %v2531_v0 }
 0x499   :  { %2066 = vmatprep.mubr.msk.f32.mxu0 %vm2532_vm0, %v2531_v0  ;;  %2063 = vmatpush3.msra.mxu0 %v927_v26 }
 0x49a   :  { %2064 = vmatprep.subr.mxu0 %v2531_v0 }
 0x49b   :  { %2065 = vmatpush3.msra.mxu0 %v926_v27 }
 0x49c   :  { %2080 = vmatprep.subr.mxu0 %v2531_v0 }
 0x548   :  { %v735_v53 = vpop.f32.mrf.mxu1 }
 0x54a   :  { %v2039_v54 = vpop.f32.mrf.mxu1 }
 0x550   :  { %v654_v55 = vpop.f32.mrf.mxu0 }
 0x551   :  { %2201 = vrcp.f32 %v654_v55 }
 0x552   :  { %v2032_v56 = vpop.f32.mrf.mxu0 }
 0x558   :  { %v805_v57 = vpop.f32.mrf.mxu0 }
 0x559   :  { %v806_v59 = vadd.f32 %v805_v57, %v735_v53  ;;  %v1889_v57 = vld [vmem:[%s3033_s20] ss:$0 sm:$0xff] }
 0x55a   :  { %v2050_v60 = vpop.f32.mrf.mxu0 }
 0x55b   :  { %v816_v61 = vadd.f32 %v1881_v58, %v806_v59 }
 0x55d   :  { %2203 = vtanh.f32 %v816_v61  ;;  %v1882_v2 = vmul.f32 -1.442695, %v816_v61 }
 0x55e   :  { %v2202_v62 = vpop.eup %2201 }
 0x55f   :  { %v659_v63 = vmul.f32 %v2202_v62, %v2200_v49  ;;  %2205 = vpow2.f32 %v1882_v2 }
 0x561   :  { %825 = vrot.lane.b32.xlu0 %v659_v63, %s2535_s19 }
 0x56a   :  { %v2204_v1 = vpop.eup %2203 }
 0x56b   :  { %830 = vrot.lane.b32.xlu1 %v2204_v1, %s2533_s13 }
 0x56c   :  { %v2206_v3 = vpop.eup %2205 }
 0x56d   :  { %v820_v4 = vadd.f32 1.0, %v2206_v3 }
 0x56f   :  { %2207 = vrcp.f32 %v820_v4 }
 0x57c   :  { %v2208_v6 = vpop.eup %2207 }
 0x5d3   :  { %v826_v9 = vpop.permute.xlu0 %825 }
 0x5d4   :  { %v828_v10 = vmul.f32 %v2208_v6, %v826_v9 }
 0x5dd   :  { %v831_v7 = vpop.permute.xlu1 %830 }
 0x5de   :  { %v833_v8 = vmul.f32 %v2208_v6, %v831_v7 }
 0x5e0   :  { %835 = vrot.lane.b32.xlu1 %v833_v8, %s2535_s19 }
 0x652   :  { %v836_v11 = vpop.permute.xlu1 %835 }
 0x653   :  { %v838_v12 = vadd.f32 %v836_v11, %v828_v10  ;;  %v1351_v10 = vld [vmem:[%s3004_s16 + $0x18] sm:$0xff]  ;;  %v1350_v11 = vld [vmem:[%s3004_s16 + $0x10] sm:$0xff] }
 0x655   :  { %2209 = vtanh.f32 %v838_v12 }
 0x662   :  { %v2210_v17 = vpop.eup %2209 }
 0x663   :  { %841 = vrot.lane.b32.xlu0 %v2210_v17, %s2533_s13  ;;  %v1509_v17 = vld [vmem:[#allocation13 + $0x18] sm:$0xff] }
 0x667   :  { %1008 = vrot.lane.b32.xlu0 %v838_v12, %s2534_s25  ;;  %v1349_v12 = vld [vmem:[%s3004_s16 + $0x8] sm:$0xff] }
 0x6d5   :  { %v842_v18 = vpop.permute.xlu0 %841 }
 0x6d6   :  { %v844_v19 = vmul.f32 %v2208_v6, %v842_v18 }
 0x6d8   :  { %850 = vrot.lane.b32.xlu1 %v844_v19, %s2535_s19  ;;  %v1508_v19 = vld [vmem:[#allocation13 + $0x10] sm:$0xff] }
 0x6d9   :  { %v1009_v25 = vpop.permute.xlu0 %1008 }
 0x74a   :  { %v851_v21 = vpop.permute.xlu1 %850 }
 0x74b   :  { %2060 = vmatmul.mubr.msk.f32.vlgmr.msra.gmra.mxu1 %vm251_vm1, %v851_v21  ;;  %v1506_v21 = vld [vmem:[#allocation13] sm:$0xff] }
 0x74c   :  { %2070 = vmatpush3.msra.mxu1 %v1006_v20  ;;  %2077 = vmatprep.mubr.msk.f32.mxu1 %vm2532_vm0, %v2531_v0  ;;  %v1507_v20 = vld [vmem:[#allocation13 + $0x8] sm:$0xff] }
 0x74d   :  { %2071 = vmatprep.subr.mxu1 %v2531_v0 }
 0x74e   :  { %2072 = vmatpush3.msra.mxu1 %v1005_v22 }
 0x74f   :  { %2073 = vmatprep.subr.mxu1 %v2531_v0 }
 0x750   :  { %2074 = vmatpush3.msra.mxu1 %v1004_v23  ;;  %v1430_v23 = vld [vmem:[#allocation19 + $0x8] sm:$0xff] }
 0x751   :  { %2075 = vmatprep.subr.mxu1 %v2531_v0 }
 0x752   :  { %2076 = vmatpush3.msra.mxu1 %v1003_v24  ;;  %v1429_v24 = vld [vmem:[#allocation19] sm:$0xff] }
 0x753   :  { %2078 = vmatmul.mubr.msk.f32.vlgmr.msra.gmra.mxu1 %vm251_vm1, %v1009_v25  ;;  %2091 = vmatprep.subr.mxu1 %v2531_v0 }
 0x754   :  { %2095 = vmatprep.mubr.msk.f32.mxu1 %vm2532_vm0, %v2531_v0  ;;  %2092 = vmatpush3.msra.mxu1 %v1168_v43 }
 0x755   :  { %2093 = vmatprep.subr.mxu1 %v2531_v0 }
 0x756   :  { %2094 = vmatpush3.msra.mxu1 %v1167_v44 }
 0x757   :  { %2109 = vmatprep.subr.mxu1 %v2531_v0 }
 0x80b   :  { %v920_v28 = vpop.f32.mrf.mxu1 }
 0x80c   :  { %v924_v29 = vmul.f32 1.442695, %v920_v28 }
 0x80d   :  { %v2061_v30 = vpop.f32.mrf.mxu1 }
 0x80e   :  { %2211 = vpow2.f32 %v924_v29 }
 0x813   :  { %v1078_v31 = vpop.f32.mrf.mxu1 }
 0x814   :  { %v1082_v32 = vmul.f32 1.442695, %v1078_v31  ;;  %v1590_v31 = vld [vmem:[#allocation20 + $0x18] sm:$0xff] }
 0x815   :  { %v2079_v33 = vpop.f32.mrf.mxu1 }
 0x816   :  { %2213 = vpow2.f32 %v1082_v32  ;;  %v1589_v33 = vld [vmem:[#allocation20 + $0x10] sm:$0xff] }
 0x81b   :  { %v2212_v35 = vpop.eup %2211 }
 0x81c   :  { %2067 = vmatmul.mubr.msk.f32.vlgmr.msra.gmra.mxu0 %vm426_vm2, %v2212_v35 }
 0x81d   :  { %2081 = vmatpush3.msra.mxu0 %v1087_v34  ;;  %2088 = vmatprep.mubr.msk.f32.mxu0 %vm2532_vm0, %v2531_v0  ;;  %v1588_v34 = vld [vmem:[#allocation20 + $0x8] sm:$0xff] }
 0x81e   :  { %2082 = vmatprep.subr.mxu0 %v2531_v0 }
 0x81f   :  { %2083 = vmatpush3.msra.mxu0 %v1086_v36 }
 0x820   :  { %2084 = vmatprep.subr.mxu0 %v2531_v0 }
 0x821   :  { %2085 = vmatpush3.msra.mxu0 %v1085_v37  ;;  %v1669_v37 = vld [vmem:[%s2997_s9 + $0x18] sm:$0xff] }
 0x822   :  { %2086 = vmatprep.subr.mxu0 %v2531_v0 }
 0x823   :  { %v2214_v39 = vpop.eup %2213  ;;  %2087 = vmatpush3.msra.mxu0 %v1084_v38  ;;  %v1668_v38 = vld [vmem:[%s2997_s9 + $0x10] sm:$0xff] }
 0x824   :  { %2089 = vmatmul.mubr.msk.f32.vlgmr.msra.gmra.mxu0 %vm251_vm1, %v2214_v39  ;;  %2098 = vmatprep.subr.mxu0 %v2531_v0 }
 0x825   :  { %2106 = vmatprep.mubr.msk.f32.mxu0 %vm2532_vm0, %v2531_v0  ;;  %2099 = vmatpush3.msra.mxu0 %v1166_v40  ;;  %v1671_v40 = vld [vmem:[#allocation8 + $0x8] sm:$0xff] }
 0x826   :  { %2100 = vmatprep.subr.mxu0 %v2531_v0 }
 0x827   :  { %2101 = vmatpush3.msra.mxu0 %v1165_v41  ;;  %v1670_v41 = vld [vmem:[#allocation8] sm:$0xff] }
 0x828   :  { %2102 = vmatprep.subr.mxu0 %v2531_v0 }
 0x829   :  { %2103 = vmatpush3.msra.mxu0 %v1164_v42  ;;  %v1666_v42 = vld [vmem:[%s2997_s9] sm:$0xff] }
 0x82a   :  { %2104 = vmatprep.subr.mxu0 %v2531_v0 }
 0x82b   :  { %2105 = vmatpush3.msra.mxu0 %v1163_v45 }
 0x82c   :  { %2107 = vmatmul.mubr.msk.f32.vlgmr.msra.gmra.mxu0 %vm251_vm1, %v2751_v5  ;;  %2120 = vmatprep.subr.mxu0 %v2531_v0 }
 0x82d   :  { %2124 = vmatprep.mubr.msk.f32.mxu0 %vm2532_vm0, %v2531_v0  ;;  %2121 = vmatpush3.msra.mxu0 %v1430_v23 }
 0x82e   :  { %2122 = vmatprep.subr.mxu0 %v2531_v0 }
 0x82f   :  { %2123 = vmatpush3.msra.mxu0 %v1429_v24 }
 0x830   :  { %2138 = vmatprep.subr.mxu0 %v2531_v0 }
 0x8dc   :  { %v997_v46 = vpop.f32.mrf.mxu0 }
 0x8dd   :  { %2215 = vrcp.f32 %v997_v46 }
 0x8de   :  { %v2068_v47 = vpop.f32.mrf.mxu0 }
 0x8e4   :  { %v1157_v48 = vpop.f32.mrf.mxu0 }
 0x8e5   :  { %2217 = vrcp.f32 %v1157_v48 }
 0x8e6   :  { %v2090_v49 = vpop.f32.mrf.mxu0 }
 0x8ea   :  { %v2216_v50 = vpop.eup %2215 }
 0x8eb   :  { %v1002_v51 = vmul.f32 %v2216_v50, %v2212_v35  ;;  %v1587_v35 = vld [vmem:[#allocation20] sm:$0xff] }
 0x8ec   :  { %v1308_v54 = vpop.f32.mrf.mxu0 }
 0x8ed   :  { %2096 = vmatmul.mubr.msk.f32.vlgmr.msra.gmra.mxu1 %vm426_vm2, %v1002_v51 }
 0x8ee   :  { %2117 = vmatprep.mubr.msk.f32.mxu1 %vm2532_vm0, %v2531_v0  ;;  %v2108_v55 = vpop.f32.mrf.mxu0  ;;  %2110 = vmatpush3.msra.mxu1 %v1351_v10 }
 0x8ef   :  { %2111 = vmatprep.subr.mxu1 %v2531_v0 }
 0x8f0   :  { %2112 = vmatpush3.msra.mxu1 %v1350_v11 }
 0x8f1   :  { %2113 = vmatprep.subr.mxu1 %v2531_v0 }
 0x8f2   :  { %v2218_v52 = vpop.eup %2217  ;;  %2114 = vmatpush3.msra.mxu1 %v1349_v12 }
 0x8f3   :  { %v1162_v53 = vmul.f32 %v2218_v52, %v2214_v39  ;;  %2115 = vmatprep.subr.mxu1 %v2531_v0  ;;  %v1667_v39 = vld [vmem:[%s2997_s9 + $0x8] sm:$0xff] }
 0x8f4   :  { %2116 = vmatpush3.msra.mxu1 %v1348_v13 }
 0x8f5   :  { %1328 = vrot.lane.b32.xlu0 %v1162_v53, %s2535_s19  ;;  %2127 = vmatprep.subr.mxu1 %v2531_v0 }
 0x967   :  { %v1329_v6 = vpop.permute.xlu0 %1328 }
 0x9ad   :  { %v1238_v56 = vpop.f32.mrf.mxu1 }
 0x9ae   :  { %v1309_v58 = vadd.f32 %v1308_v54, %v1238_v56 }
 0x9af   :  { %v2097_v59 = vpop.f32.mrf.mxu1 }
 0x9b0   :  { %v1319_v60 = vadd.f32 %v1889_v57, %v1309_v58 }
 0x9b2   :  { %2219 = vtanh.f32 %v1319_v60  ;;  %v1890_v62 = vmul.f32 -1.442695, %v1319_v60 }
 0x9b4   :  { %2221 = vpow2.f32 %v1890_v62 }
 0x9bf   :  { %v2220_v61 = vpop.eup %2219 }
 0x9c0   :  { %1333 = vrot.lane.b32.xlu1 %v2220_v61, %s2533_s13 }
 0x9c1   :  { %v2222_v63 = vpop.eup %2221 }
 0x9c2   :  { %v1323_v1 = vadd.f32 1.0, %v2222_v63 }
 0x9c4   :  { %2223 = vrcp.f32 %v1323_v1 }
 0x9d1   :  { %v2224_v2 = vpop.eup %2223 }
 0x9d2   :  { %v1331_v7 = vmul.f32 %v2224_v2, %v1329_v6 }
 0xa32   :  { %v1334_v3 = vpop.permute.xlu1 %1333 }
 0xa33   :  { %v1336_v4 = vmul.f32 %v2224_v2, %v1334_v3 }
 0xa35   :  { %1338 = vrot.lane.b32.xlu1 %v1336_v4, %s2535_s19 }
 0xaa7   :  { %v1339_v8 = vpop.permute.xlu1 %1338 }
 0xaa8   :  { %v1341_v9 = vadd.f32 %v1339_v8, %v1331_v7 }
 0xaaa   :  { %2225 = vtanh.f32 %v1341_v9 }
 0xab7   :  { %v2226_v14 = vpop.eup %2225 }
 0xab8   :  { %1344 = vrot.lane.b32.xlu0 %v2226_v14, %s2533_s13 }
 0xabc   :  { %1511 = vrot.lane.b32.xlu0 %v1341_v9, %s2534_s25 }
 0xb2a   :  { %v1345_v15 = vpop.permute.xlu0 %1344 }
 0xb2b   :  { %v1347_v16 = vmul.f32 %v2224_v2, %v1345_v15 }
 0xb2d   :  { %1353 = vrot.lane.b32.xlu1 %v1347_v16, %s2535_s19 }
 0xb2e   :  { %v1512_v22 = vpop.permute.xlu0 %1511 }
 0xb9f   :  { %v1354_v18 = vpop.permute.xlu1 %1353 }
 0xba0   :  { %2118 = vmatmul.mubr.msk.f32.vlgmr.msra.gmra.mxu1 %vm251_vm1, %v1354_v18 }
 0xba1   :  { %2128 = vmatpush3.msra.mxu1 %v1509_v17  ;;  %2135 = vmatprep.mubr.msk.f32.mxu1 %vm2532_vm0, %v2531_v0 }
 0xba2   :  { %2129 = vmatprep.subr.mxu1 %v2531_v0 }
 0xba3   :  { %2130 = vmatpush3.msra.mxu1 %v1508_v19 }
 0xba4   :  { %2131 = vmatprep.subr.mxu1 %v2531_v0 }
 0xba5   :  { %2132 = vmatpush3.msra.mxu1 %v1507_v20 }
 0xba6   :  { %2133 = vmatprep.subr.mxu1 %v2531_v0 }
 0xba7   :  { %2134 = vmatpush3.msra.mxu1 %v1506_v21 }
 0xba8   :  { %2136 = vmatmul.mubr.msk.f32.vlgmr.msra.gmra.mxu1 %vm251_vm1, %v1512_v22  ;;  %2149 = vmatprep.subr.mxu1 %v2531_v0 }
 0xba9   :  { %2153 = vmatprep.mubr.msk.f32.mxu1 %vm2532_vm0, %v2531_v0  ;;  %2150 = vmatpush3.msra.mxu1 %v1671_v40 }
 0xbaa   :  { %2151 = vmatprep.subr.mxu1 %v2531_v0 }
 0xbab   :  { %2152 = vmatpush3.msra.mxu1 %v1670_v41 }
 0xc60   :  { %v1423_v25 = vpop.f32.mrf.mxu1 }
 0xc61   :  { %v1427_v26 = vmul.f32 1.442695, %v1423_v25 }
 0xc62   :  { %v2119_v27 = vpop.f32.mrf.mxu1 }
 0xc63   :  { %2227 = vpow2.f32 %v1427_v26 }
 0xc68   :  { %v1581_v28 = vpop.f32.mrf.mxu1 }
 0xc69   :  { %v1585_v29 = vmul.f32 1.442695, %v1581_v28 }
 0xc6a   :  { %v2137_v30 = vpop.f32.mrf.mxu1 }
 0xc6b   :  { %2229 = vpow2.f32 %v1585_v29 }
 0xc70   :  { %v2228_v32 = vpop.eup %2227 }
 0xc71   :  { %2125 = vmatmul.mubr.msk.f32.vlgmr.msra.gmra.mxu0 %vm426_vm2, %v2228_v32 }
 0xc72   :  { %2139 = vmatpush3.msra.mxu0 %v1590_v31  ;;  %2146 = vmatprep.mubr.msk.f32.mxu0 %vm2532_vm0, %v2531_v0 }
 0xc73   :  { %2140 = vmatprep.subr.mxu0 %v2531_v0 }
 0xc74   :  { %2141 = vmatpush3.msra.mxu0 %v1589_v33 }
 0xc75   :  { %2142 = vmatprep.subr.mxu0 %v2531_v0 }
 0xc76   :  { %2143 = vmatpush3.msra.mxu0 %v1588_v34 }
 0xc77   :  { %2144 = vmatprep.subr.mxu0 %v2531_v0 }
 0xc78   :  { %v2230_v36 = vpop.eup %2229  ;;  %2145 = vmatpush3.msra.mxu0 %v1587_v35 }
 0xc79   :  { %2147 = vmatmul.mubr.msk.f32.vlgmr.msra.gmra.mxu0 %vm251_vm1, %v2230_v36  ;;  %2156 = vmatprep.subr.mxu0 %v2531_v0 }
 0xc7a   :  { %2164 = vmatprep.mubr.msk.f32.mxu0 %vm2532_vm0, %v2531_v0  ;;  %2157 = vmatpush3.msra.mxu0 %v1669_v37 }
 0xc7b   :  { %2158 = vmatprep.subr.mxu0 %v2531_v0 }
 0xc7c   :  { %2159 = vmatpush3.msra.mxu0 %v1668_v38 }
 0xc7d   :  { %2160 = vmatprep.subr.mxu0 %v2531_v0 }
 0xc7e   :  { %2161 = vmatpush3.msra.mxu0 %v1667_v39 }
 0xc7f   :  { %2162 = vmatprep.subr.mxu0 %v2531_v0 }
 0xc80   :  { %2163 = vmatpush3.msra.mxu0 %v1666_v42 }
 0xc81   :  { %2165 = vmatmul.mubr.msk.f32.vlgmr.msra.gmra.mxu0 %vm251_vm1, %v2751_v5  ;;  %v1897_v5 = vld [vmem:[%s2999_s11] ss:$0 sm:$0xff]  ;;  %s2536_s11 = smov [#allocation22]  }
 0xc82   :  { %s1857_s5 = sshll.u32 %s2536_s11, 4  ;;  %s1858_s5 = int_to_ptr.vmem [resolvable:$true] %s1857_s5 }
 0xc83   :  { %p2486_p5 = scmp.lt.s32.totalorder %s1858_s5, %s1858_s5 }
 0xd31   :  { %v1500_v43 = vpop.f32.mrf.mxu0 }
 0xd32   :  { %2231 = vrcp.f32 %v1500_v43 }
 0xd33   :  { %v2126_v44 = vpop.f32.mrf.mxu0 }
 0xd39   :  { %v1660_v45 = vpop.f32.mrf.mxu0 }
 0xd3a   :  { %2233 = vrcp.f32 %v1660_v45 }
 0xd3b   :  { %v2148_v46 = vpop.f32.mrf.mxu0 }
 0xd3f   :  { %v2232_v47 = vpop.eup %2231 }
 0xd40   :  { %v1505_v48 = vmul.f32 %v2232_v47, %v2228_v32 }
 0xd41   :  { %v1811_v51 = vpop.f32.mrf.mxu0 }
 0xd42   :  { %2154 = vmatmul.mubr.msk.f32.vlgmr.msra.gmra.mxu1 %vm426_vm2, %v1505_v48 }
 0xd43   :  { %v2166_v0 = vpop.f32.mrf.mxu0 }
 0xd47   :  { %v2234_v49 = vpop.eup %2233 }
 0xd48   :  { %v1665_v50 = vmul.f32 %v2234_v49, %v2230_v36 }
 0xd4a   :  { %1831 = vrot.lane.b32.xlu0 %v1665_v50, %s2535_s19 }
 0xdbc   :  { %v1832_v63 = vpop.permute.xlu0 %1831 }
 0xe02   :  { %v1741_v52 = vpop.f32.mrf.mxu1 }
 0xe03   :  { %v1812_v53 = vadd.f32 %v1811_v51, %v1741_v52 }
 0xe04   :  { %v2155_v54 = vpop.f32.mrf.mxu1 }
 0xe05   :  { %v1822_v55 = vadd.f32 %v1897_v5, %v1812_v53 }
 0xe07   :  { %2235 = vtanh.f32 %v1822_v55  ;;  %v1898_v57 = vmul.f32 -1.442695, %v1822_v55 }
 0xe09   :  { %2237 = vpow2.f32 %v1898_v57 }
 0xe14   :  { %v2236_v56 = vpop.eup %2235 }
 0xe15   :  { %1836 = vrot.lane.b32.xlu1 %v2236_v56, %s2533_s13  ;;  %s2481_s13 = scalar_lea.vmem %s1858_s5, 64 }
 0xe16   :  { %v2238_v58 = vpop.eup %2237  ;;  %p2482_p4 = scmp.ne.s32.totalorder %s1858_s5, %s2481_s13  ;;  %p2487_p6 = scmp.lt.s32.totalorder %s2481_s13, %s2481_s13 }
 0xe17   :  { %v1826_v59 = vadd.f32 1.0, %v2238_v58 }
 0xe18   :  { %p2488_p7 = por %p2487_p6, %p2486_p5 }
 0xe19   :  { %2239 = vrcp.f32 %v1826_v59 }
 0xe1a   :  { %p2489_p8 = pnand %p2488_p7, %p2482_p4 }
 0xe26   :  { %v2240_v60 = vpop.eup %2239 }
 0xe27   :  { %v1834_v1 = vmul.f32 %v2240_v60, %v1832_v63 }
 0xe87   :  { %v1837_v61 = vpop.permute.xlu1 %1836 }
 0xe88   :  { %v1839_v62 = vmul.f32 %v2240_v60, %v1837_v61 }
 0xe8a   :  { %1841 = vrot.lane.b32.xlu1 %v1839_v62, %s2535_s19 }
 0xefc   :  { %v1842_v2 = vpop.permute.xlu1 %1841 }
 0xefd   :  { %v1844_v3 = vadd.f32 %v1842_v2, %v1834_v1 }
 0xeff   :  { %1846 = vrot.lane.b32.xlu0 %v1844_v3, %s2534_s25 }
 0xf71   :  { %v1847_v4 = vpop.permute.xlu0 %1846 }
 0xf72   :  { %1850 = vst.msk [vmem:[#allocation22] sm:$0xf] %vm1849_vm3, %v1847_v4 }
 0xf73   :  { %2492 = shalt.err (!%p2489_p8)
}
 0xf74   :  { %1860 = dma.vmem_to_hbm [thread:$0]  %s1858_s5, 64, %s3012_s24, [#allocation4]  }
 0xf75   :  { %2515 = dma.done.wait [#allocation4], 64  }
 0xf76   :  { %2516 = vsyncadd [#allocation4], 4294967232 }
 0xf77   :  { %1864 = vsyncpa [#allocation3], 1 }
 0xf78   :  { %1865 = vsyncpa [#allocation6], 1 }
 0xf79   :  { %1866 = vsyncpa [#allocation9], 1 }
 0xf7a   :  { %1867 = vsyncpa [#allocation12], 1 }
 0xf7b   :  { %1868 = vsyncpa [#allocation15], 1 }
 0xf7c   :  { %1869 = vsyncpa [#allocation18], 1 }
 0xf7d   :  { %1870 = vsyncpa [#allocation21], 1 }
 0xf7e   :  { %1871 = vsyncpa [#allocation4], 1 }

</bundles_post_ra>
